<compile_context>
chip_gen: v6e
topology: v6e:2x2x1
jax: 0.10.0
libtpu: 0.0.40
codegen_flags: <defaults>
</compile_context>

<pallas_src>
import functools

import jax
import jax.numpy as jnp
from jax.experimental import pallas as pl
from jax.experimental.pallas import tpu as pltpu


def _round_up(n, m):
    return ((n + m - 1) // m) * m


def _channel_attention_kernel(x_ref, w1_ref, b1_ref, w2_ref, b2_ref, o_ref,
                              *, hw_valid):
    # x_ref / o_ref: (B_TILE, c, hw_pad) f32 block.
    # w1_ref: (c, c_red), b1_ref: (1, c_red), w2_ref: (c_red, c), b2_ref: (1, c)
    bt, _, hw_pad = x_ref.shape
    inv_hw = jnp.float32(1.0 / hw_valid)             # static reciprocal (no divide)

    x = x_ref[...]                                   # (bt, c, hw_pad)

    # Global average pool: zero-padding does not affect the sum.
    y_avg = jnp.sum(x, axis=-1) * inv_hw             # (bt, c)

    # Global max pool: mask padded lanes (static no-op when hw is 128-dense).
    if hw_pad != hw_valid:
        lane = jax.lax.broadcasted_iota(jnp.int32, x.shape, 2)
        x = jnp.where(lane < hw_valid, x, -jnp.inf)
    y_max = jnp.max(x, axis=-1)                      # (bt, c)
    del x                                            # don't keep the slab live

    # Fused avg/max MLP: one dot per layer on the stacked pooled matrix.
    pooled = jnp.concatenate([y_avg, y_max], axis=0)                       # (2*bt, c)
    h = jnp.dot(pooled, w1_ref[...], preferred_element_type=jnp.float32)
    h = jnp.maximum(h + b1_ref[...], 0.0)                                  # ReLU
    s = jnp.dot(h, w2_ref[...], preferred_element_type=jnp.float32)
    s = jax.nn.sigmoid(s + b2_ref[...])                                    # (2*bt, c)
    scale = s[:bt] + s[bt:]                                                # (bt, c)

    # Re-read the ref so the final multiply/store streams straight from VMEM.
    o_ref[...] = x_ref[...] * scale[:, :, None]


@jax.jit
def channel_attention(x, w1, b1, w2, b2):
    """x: (b, c, h, w) float32.

    Weights follow PyTorch Linear semantics but are stored pre-transposed for
    right-multiplication: w1 (c, c_red), w2 (c_red, c); biases b1 (c_red,), b2 (c,).
    """
    b, c, h, w = x.shape
    hw = h * w
    hw_pad = max(_round_up(hw, 128), 128)            # lane-dense minor dim
    c_red = w1.shape[1]
    itemsize = x.dtype.itemsize

    x_flat = x.reshape(b, c, hw)
    if hw_pad != hw:
        x_flat = jnp.pad(x_flat, ((0, 0), (0, 0), (0, hw_pad - hw)))
    b1_2d = b1.reshape(1, -1)
    b2_2d = b2.reshape(1, -1)

    # Generation-aware VMEM budget (v5e/v6e: 128 MiB physical, v7x: 64 MiB/TC).
    try:
        vmem_cap = int(pltpu.get_tpu_info().vmem_capacity_bytes)
    except Exception:
        vmem_cap = 64 << 20                          # conservative fallback (v7x)
    vmem_budget = int(vmem_cap * 0.75)

    # Batch tile: biggest divisor of b whose block stays within the target so
    # 2x double-buffered (in + out) slabs fit comfortably in the budget.
    per_image = c * hw_pad * itemsize
    target_block = min(4 << 20, max(vmem_budget // 8, per_image))
    b_tile = 1
    for d in range(1, b + 1):
        if b % d == 0 and d * per_image <= target_block:
            b_tile = d
    grid = (b // b_tile,)
    # NOTE(v7x megacore): with multiple batch blocks the "parallel" axis shards
    # across both TensorCores; at the single-block small-shape case one core
    # idles, which is fine (the whole problem is a few KiB).

    block_bytes = b_tile * per_image
    weight_bytes = (w1.size + b1.size + w2.size + b2.size) * 4
    needed = 4 * block_bytes + 4 * weight_bytes + (8 << 20)
    vmem_limit = int(min(max(needed, 16 << 20), vmem_budget))

    cost = pl.CostEstimate(
        flops=8 * b * c * c_red + 2 * b * c * hw,
        transcendentals=2 * b * c,
        bytes_accessed=2 * b * c * hw_pad * itemsize + weight_bytes,
    )

    kernel = functools.partial(_channel_attention_kernel, hw_valid=hw)

    out_flat = pl.pallas_call(
        kernel,
        out_shape=jax.ShapeDtypeStruct((b, c, hw_pad), x.dtype),
        grid=grid,
        in_specs=[
            # One batch tile per grid step (pipelined / double-buffered).
            pl.BlockSpec((b_tile, c, hw_pad), lambda i: (i, 0, 0)),
            # Weights: constant block index -> fetched once, resident across steps.
            pl.BlockSpec((c, c_red), lambda i: (0, 0)),
            pl.BlockSpec((1, c_red), lambda i: (0, 0)),
            pl.BlockSpec((c_red, c), lambda i: (0, 0)),
            pl.BlockSpec((1, c), lambda i: (0, 0)),
        ],
        out_specs=pl.BlockSpec((b_tile, c, hw_pad), lambda i: (i, 0, 0)),
        input_output_aliases={0: 0},                 # pure in-place modulation of x
        cost_estimate=cost,
        compiler_params=pltpu.CompilerParams(
            dimension_semantics=("parallel",),
            vmem_limit_bytes=vmem_limit,
        ),
    )(x_flat, w1, b1_2d, w2, b2_2d)

    out = out_flat[:, :, :hw] if hw_pad != hw else out_flat
    return out.reshape(b, c, h, w)


def _reference(x, w1, b1, w2, b2):
    """Pure-JAX reference mirroring the PyTorch forward."""
    y_avg_in = jnp.mean(x, axis=(2, 3))
    y_max_in = jnp.max(x, axis=(2, 3))

    def fc(v):
        hdn = jnp.maximum(v @ w1 + b1, 0.0)
        return jax.nn.sigmoid(hdn @ w2 + b2)

    scale = fc(y_avg_in) + fc(y_max_in)
    return x * scale[:, :, None, None]


if __name__ == "__main__":
    key = jax.random.PRNGKey(0)
    batch, channels, spatial, reduction = 2, 4, 16, 4   # hw = 256 (lane-dense)
    c_red = max(channels // reduction, 1)

    kx, kw1, kb1, kw2, kb2 = jax.random.split(key, 5)

    x = jax.random.normal(kx, (batch, channels, spatial, spatial), dtype=jnp.float32)

    # Deterministic parameter init (uniform, roughly matching PyTorch Linear scale).
    bound1 = 1.0 / (channels ** 0.5)
    w1 = jax.random.uniform(kw1, (channels, c_red), jnp.float32, -bound1, bound1)
    b1 = jax.random.uniform(kb1, (c_red,), jnp.float32, -bound1, bound1)
    bound2 = 1.0 / (c_red ** 0.5)
    w2 = jax.random.uniform(kw2, (c_red, channels), jnp.float32, -bound2, bound2)
    b2 = jax.random.uniform(kb2, (channels,), jnp.float32, -bound2, bound2)

    out = jax.block_until_ready(channel_attention(x, w1, b1, w2, b2))
    ref = _reference(x, w1, b1, w2, b2)

    assert out.shape == x.shape
    assert jnp.allclose(out, ref, atol=1e-5, rtol=1e-5), "mismatch vs reference"

    print("KERNEL_OK")
</pallas_src>

<mosaic_0001>
module attributes {stable_mosaic.version = 11 : i64} {
  func.func @_channel_attention_kernel(%arg0: i32, %arg1: memref<2x4x256xf32, #tpu.memory_space<vmem>>, %arg2: memref<4x1xf32, #tpu.memory_space<vmem>>, %arg3: memref<1x1xf32, #tpu.memory_space<vmem>>, %arg4: memref<1x4xf32, #tpu.memory_space<vmem>>, %arg5: memref<1x4xf32, #tpu.memory_space<vmem>>, %arg6: memref<2x4x256xf32, #tpu.memory_space<vmem>>) attributes {dimension_semantics = [#tpu.dimension_semantics<parallel>], iteration_bounds = array<i64: 1>, scalar_prefetch = 0 : i64, scratch_operands = 0 : i64, tpu.core_type = #tpu.core_type<tc>, window_params = [{transform_indices = @transform_0, window_bounds = array<i64: 2, 4, 256>}, {pipeline_mode = #tpu.pipeline_mode<synchronous>, transform_indices = @transform_1, window_bounds = array<i64: 4, 1>}, {pipeline_mode = #tpu.pipeline_mode<synchronous>, transform_indices = @transform_2, window_bounds = array<i64: 1, 1>}, {pipeline_mode = #tpu.pipeline_mode<synchronous>, transform_indices = @transform_3, window_bounds = array<i64: 1, 4>}, {pipeline_mode = #tpu.pipeline_mode<synchronous>, transform_indices = @transform_4, window_bounds = array<i64: 1, 4>}, {transform_indices = @transform_5, window_bounds = array<i64: 2, 4, 256>}]} {
    %c0 = arith.constant 0 : index
    %c0_0 = arith.constant 0 : index
    %c0_1 = arith.constant 0 : index
    %0 = vector.load %arg1[%c0, %c0_0, %c0_1] : memref<2x4x256xf32, #tpu.memory_space<vmem>>, vector<2x4x256xf32>
    %cst = arith.constant dense<0.000000e+00> : vector<2x4xf32>
    %1 = vector.multi_reduction <add>, %0, %cst [2] : vector<2x4x256xf32> to vector<2x4xf32>
    %cst_2 = arith.constant 3.906250e-03 : f32
    %2 = vector.broadcast %cst_2 : f32 to vector<2x4xf32>
    %3 = arith.mulf %1, %2 : vector<2x4xf32>
    %cst_3 = arith.constant dense<0xFF800000> : vector<2x4xf32>
    %4 = vector.multi_reduction <maximumf>, %0, %cst_3 [2] : vector<2x4x256xf32> to vector<2x4xf32>
    %5 = tpu.concatenate %3, %4 in 0 : vector<2x4xf32>, vector<2x4xf32> -> vector<4x4xf32>
    %c0_4 = arith.constant 0 : index
    %c0_5 = arith.constant 0 : index
    %6 = vector.load %arg2[%c0_4, %c0_5] : memref<4x1xf32, #tpu.memory_space<vmem>>, vector<4x1xf32>
    %cst_6 = arith.constant dense<0.000000e+00> : vector<4x1xf32>
    %7 = tpu.matmul %5, %6, %cst_6 {dimension_numbers = #tpu.dot_dimension_numbers<[1], [0], [0], [1], [0, 0, 1, 1], [], []>} : vector<4x4xf32>, vector<4x1xf32>, vector<4x1xf32> -> vector<4x1xf32>
    %c0_7 = arith.constant 0 : index
    %c0_8 = arith.constant 0 : index
    %8 = vector.load %arg3[%c0_7, %c0_8] : memref<1x1xf32, #tpu.memory_space<vmem>>, vector<1x1xf32>
    %9 = vector.broadcast %8 : vector<1x1xf32> to vector<4x1xf32>
    %10 = arith.addf %7, %9 : vector<4x1xf32>
    %cst_9 = arith.constant 0.000000e+00 : f32
    %11 = vector.broadcast %cst_9 : f32 to vector<4x1xf32>
    %12 = arith.maximumf %10, %11 : vector<4x1xf32>
    %c0_10 = arith.constant 0 : index
    %c0_11 = arith.constant 0 : index
    %13 = vector.load %arg4[%c0_10, %c0_11] : memref<1x4xf32, #tpu.memory_space<vmem>>, vector<1x4xf32>
    %cst_12 = arith.constant dense<0.000000e+00> : vector<4x4xf32>
    %14 = tpu.matmul %12, %13, %cst_12 {dimension_numbers = #tpu.dot_dimension_numbers<[1], [0], [0], [1], [0, 0, 1, 1], [], []>} : vector<4x1xf32>, vector<1x4xf32>, vector<4x4xf32> -> vector<4x4xf32>
    %c0_13 = arith.constant 0 : index
    %c0_14 = arith.constant 0 : index
    %15 = vector.load %arg5[%c0_13, %c0_14] : memref<1x4xf32, #tpu.memory_space<vmem>>, vector<1x4xf32>
    %16 = vector.broadcast %15 : vector<1x4xf32> to vector<4x4xf32>
    %17 = arith.addf %14, %16 : vector<4x4xf32>
    %18 = arith.negf %17 : vector<4x4xf32>
    %19 = math.exp %18 : vector<4x4xf32>
    %cst_15 = arith.constant 1.000000e+00 : f32
    %20 = vector.broadcast %cst_15 : f32 to vector<4x4xf32>
    %21 = arith.addf %20, %19 : vector<4x4xf32>
    %22 = arith.divf %20, %21 : vector<4x4xf32>
    %23 = vector.extract_strided_slice %22 {offsets = [0, 0], sizes = [2, 4], strides = [1, 1]} : vector<4x4xf32> to vector<2x4xf32>
    %24 = vector.extract_strided_slice %22 {offsets = [2, 0], sizes = [2, 4], strides = [1, 1]} : vector<4x4xf32> to vector<2x4xf32>
    %25 = arith.addf %23, %24 : vector<2x4xf32>
    %c0_16 = arith.constant 0 : index
    %c0_17 = arith.constant 0 : index
    %c0_18 = arith.constant 0 : index
    %26 = vector.load %arg1[%c0_16, %c0_17, %c0_18] : memref<2x4x256xf32, #tpu.memory_space<vmem>>, vector<2x4x256xf32>
    %27 = vector.shape_cast %25 : vector<2x4xf32> to vector<2x4x1xf32>
    %28 = vector.broadcast %27 : vector<2x4x1xf32> to vector<2x4x256xf32>
    %29 = arith.mulf %26, %28 : vector<2x4x256xf32>
    %c0_19 = arith.constant 0 : index
    %c0_20 = arith.constant 0 : index
    %c0_21 = arith.constant 0 : index
    %30 = vector.load %arg6[%c0_19, %c0_20, %c0_21] : memref<2x4x256xf32, #tpu.memory_space<vmem>>, vector<2x4x256xf32>
    tpu.vector_store %arg6[%c0_19, %c0_20, %c0_21], %29 {strides = array<i32>} : memref<2x4x256xf32, #tpu.memory_space<vmem>>, vector<2x4x256xf32>,
    return
  }
  func.func @transform_0(%arg0: i32) -> (i32, i32, i32) {
    %c0_i32 = arith.constant 0 : i32
    %c0_i32_0 = arith.constant 0 : i32
    %c0_i32_1 = arith.constant 0 : i32
    return %arg0, %c0_i32, %c0_i32_0 : i32, i32, i32
  }
  func.func @transform_1(%arg0: i32) -> (i32, i32) {
    %c0_i32 = arith.constant 0 : i32
    %c0_i32_0 = arith.constant 0 : i32
    %c0_i32_1 = arith.constant 0 : i32
    return %c0_i32, %c0_i32_0 : i32, i32
  }
  func.func @transform_2(%arg0: i32) -> (i32, i32) {
    %c0_i32 = arith.constant 0 : i32
    %c0_i32_0 = arith.constant 0 : i32
    %c0_i32_1 = arith.constant 0 : i32
    return %c0_i32, %c0_i32_0 : i32, i32
  }
  func.func @transform_3(%arg0: i32) -> (i32, i32) {
    %c0_i32 = arith.constant 0 : i32
    %c0_i32_0 = arith.constant 0 : i32
    %c0_i32_1 = arith.constant 0 : i32
    return %c0_i32, %c0_i32_0 : i32, i32
  }
  func.func @transform_4(%arg0: i32) -> (i32, i32) {
    %c0_i32 = arith.constant 0 : i32
    %c0_i32_0 = arith.constant 0 : i32
    %c0_i32_1 = arith.constant 0 : i32
    return %c0_i32, %c0_i32_0 : i32, i32
  }
  func.func @transform_5(%arg0: i32) -> (i32, i32, i32) {
    %c0_i32 = arith.constant 0 : i32
    %c0_i32_0 = arith.constant 0 : i32
    %c0_i32_1 = arith.constant 0 : i32
    return %arg0, %c0_i32, %c0_i32_0 : i32, i32, i32
  }
}

</mosaic_0001>

<bundles_post_ra>
// kernel: channel_attention.1
= control target key start
LH: loop header
LB: loop body
LE: loop exit
PB: predicated region body
PF: predicated region fallthrough
CT: control target
= control target key end

     0   :  { %vm30_vm0 = vcmask 1043456   ;;  %v335_v16 = vmov 0.0   ;;  %vm336_vm1 = vmmov 0   ;;  %v55_v19 = vlaneseq  ;;  %s415_s0 = inlined_call_operand.vmem [shape: f32[2,4,256], index: 0, kind: input, shape index: {}, may-alias: {0,5}]   ;;  %s416_s1 = inlined_call_operand.vmem [shape: f32[4,1], index: 1, kind: input, shape index: {}]   ;;  %s417_s2 = inlined_call_operand.<no memory space> [shape: f32[1,1], index: 2, kind: input, shape index: {}]   ;;  %s418_s3 = inlined_call_operand.vmem [shape: f32[1,4], index: 3, kind: input, shape index: {}]   ;;  %s419_s4 = inlined_call_operand.vmem [shape: f32[1,4], index: 4, kind: input, shape index: {}]   ;;  %s420_s5 = inlined_call_operand.vmem [shape: f32[2,4,256], index: 5, kind: output, shape index: {}, may-alias: {0,5}]  }
   0x1   :  { %v371_v0 = vld [vmem:[%s415_s0] sm:$0xff]  ;;  %v376_v1 = vld [vmem:[%s415_s0 + $0x8] sm:$0xff]  ;;  %316 = vmatprep.subr.mxu0 %v335_v16  ;;  %318 = vmatprep.mubr.msk.f32.mxu0 %vm336_vm1, %v335_v16  ;;  %v10_v18 = vstv %s417_s2  ;;  %vm78_vm2 = vcmask 1043459   ;;  %vm65_vm3 = vcmask 1041409   ;;  %vm81_vm4 = vcmask 1041408  }
   0x2   :  { %v26_v2 = vcombine.high %v371_v0, %v371_v0  ;;  %v43_v3 = vsel %vm30_vm0, %v371_v0, -inf  ;;  %v31_v4 = vsel %vm30_vm0, %v371_v0, 0.0  ;;  %v27_v5 = vcombine.high %v376_v1, %v376_v1  ;;  %v83_v17 = vld [vmem:[%s416_s1] sm:$0xf]  ;;  %321 = vmatprep.subr.mxu1 %v335_v16  ;;  %323 = vmatprep.mubr.msk.f32.mxu1 %vm336_vm1, %v335_v16  ;;  %11 = vst [vmem:[#allocation2] sm:$0x1] %v10_v18 }
   0x3   :  { %v48_v6 = vsel %vm30_vm0, %v376_v1, -inf  ;;  %v36_v7 = vsel %vm30_vm0, %v376_v1, 0.0  ;;  %317 = vmatpush3.msk.msra.mxu0 %vm30_vm0, %v83_v17  ;;  %v56_v20 = vand.u32 127, %v55_v19  ;;  %v58_v21 = vshrl.u32 %v55_v19, 7  ;;  %v169_v36 = vld [vmem:[%s418_s3] sm:$0x1] }
   0x4   :  { %v44_v8 = vsel %vm30_vm0, %v26_v2, -inf  ;;  %v32_v9 = vsel %vm30_vm0, %v26_v2, 0.0  ;;  %v49_v10 = vsel %vm30_vm0, %v27_v5, -inf  ;;  %v37_v11 = vsel %vm30_vm0, %v27_v5, 0.0  ;;  %v308_v42 = vld [vmem:[%s419_s4] ss:$0 sm:$0xff] }
   0x5   :  { %v45_v12 = vmax.f32 %v43_v3, %v44_v8  ;;  %v33_v13 = vadd.f32 %v32_v9, %v31_v4  ;;  %v50_v14 = vmax.f32 %v48_v6, %v49_v10  ;;  %v38_v15 = vadd.f32 %v37_v11, %v36_v7 }
   0x6   :  { %v59_v24 = vsub.s32 %v56_v20, %v58_v21  ;;  %vm91_vm5 = vcmask 31744   ;;  %vm181_vm6 = vcmask 1040384   ;;  %vm177_vm7 = vcmask 7168  }
   0x7   :  { %46 = vmax.xlane.f32.xlu1 %v45_v12  ;;  %34 = vadd.xlane.f32.xlu0 %v33_v13  ;;  %v274_v51 = vsub.s32 1, %v58_v21  ;;  %v267_v52 = vsub.s32 0, %v58_v21  ;;  %v337_v56 = vmov 839922192  }
   0x8   :  { %322 = vmatpush3.msk.msra.mxu1 %vm181_vm6, %v169_v36  ;;  %v282_v57 = vunpack.c.l.s4 %v337_v56 }
   0x9   :  { %v305_v37 = vld [vmem:[#allocation2] ss:$0 sm:$0xff] }
   0xa   :  { %v283_v58 = vunpack.c.0.s8 %v282_v57 }
   0xb   :  { %51 = vmax.xlane.f32.xlu1 %v50_v14  ;;  %39 = vadd.xlane.f32.xlu0 %v38_v15 }
   0xc   :  { %v286_v59 = vsub.s32 %v283_v58, %v58_v21 }
  0x90   :  { %v47_v22 = vpop.xlane.xlu1 %46  ;;  %v35_v23 = vpop.xlane.xlu0 %34 }
  0x91   :  { %v41_v25 = vmul.f32 0.00390625, %v35_v23  ;;  %v73_v30 = vrot.slane %v47_v22, %v59_v24 }
  0x93   :  { %v60_v31 = vrot.slane %v41_v25, %v59_v24 }
  0x94   :  { %v52_v26 = vpop.xlane.xlu1 %51  ;;  %v40_v27 = vpop.xlane.xlu0 %39 }
  0x95   :  { %v77_v28 = vrot.slane %v52_v26, %v59_v24  ;;  %v42_v29 = vmul.f32 0.00390625, %v40_v27 }
  0x97   :  { %v64_v32 = vrot.slane %v42_v29, %v59_v24  ;;  %v79_v33 = vsel %vm78_vm2, %v77_v28, %v73_v30 }
  0x99   :  { %v66_v34 = vsel %vm65_vm3, %v64_v32, %v60_v31 }
  0x9a   :  { %v82_v35 = vsel %vm81_vm4, %v66_v34, %v79_v33 }
  0x9b   :  { %319 = vmatmul.mubr.msk.f32.vlgmr.msra.gmra.mxu0 %vm91_vm5, %v82_v35 }
 0x15b   :  { %v164_v38 = vpop.f32.mrf.mxu0 }
 0x15c   :  { %v165_v39 = vadd.f32 %v305_v37, %v164_v38 }
 0x15d   :  { %v320_v40 = vpop.f32.mrf.mxu0 }
 0x15e   :  { %v168_v41 = vmax.f32 %v165_v39, 0.0 }
 0x160   :  { %324 = vmatmul.mubr.msk.f32.vlgmr.msra.gmra.mxu1 %vm177_vm7, %v168_v41 }
 0x220   :  { %v251_v43 = vpop.f32.mrf.mxu1 }
 0x221   :  { %v252_v44 = vadd.f32 %v308_v42, %v251_v43 }
 0x222   :  { %v325_v45 = vpop.f32.mrf.mxu1 }
 0x223   :  { %v311_v46 = vmul.f32 -1.442695, %v252_v44 }
 0x225   :  { %331 = vpow2.f32 %v311_v46 }
 0x232   :  { %v332_v47 = vpop.eup %331 }
 0x233   :  { %v258_v48 = vadd.f32 1.0, %v332_v47 }
 0x235   :  { %333 = vrcp.f32 %v258_v48 }
 0x242   :  { %v334_v49 = vpop.eup %333 }
 0x243   :  { %v262_v50 = vrot.slane %v334_v49, 2 }
 0x245   :  { %v264_v53 = vadd.f32 %v334_v49, %v262_v50 }
 0x247   :  { %v275_v54 = vrot.slane %v264_v53, %v274_v51  ;;  %v268_v55 = vrot.slane %v264_v53, %v267_v52 }
 0x249   :  { %277 = vbcast.lane.b32.xlu1 %v275_v54, 256  ;;  %270 = vbcast.lane.b32.xlu0 %v268_v55, 256 }
 0x2bb   :  { %v278_v60 = vpop.permute.xlu1 %277  ;;  %v271_v61 = vpop.permute.xlu0 %270 }
 0x2bc   :  { %v294_v62 = vrot.slane %v278_v60, %v286_v59  ;;  %v287_v63 = vrot.slane %v271_v61, %v286_v59 }
 0x2be   :  { %v298_v2 = vmul.f32 %v294_v62, %v376_v1  ;;  %v297_v3 = vmul.f32 %v287_v63, %v371_v0 }
 0x2c0   :  { %300 = vst [vmem:[%s420_s5 + $0x8] sm:$0xff] %v298_v2  ;;  %299 = vst [vmem:[%s420_s5] sm:$0xff] %v297_v3 }

</bundles_post_ra>
